<compile_context>
chip_gen: v6e
topology: v6e:2x2x1
jax: 0.10.0
libtpu: 0.0.40
codegen_flags: <defaults>
</compile_context>

<pallas_src>
import jax
import jax.numpy as jnp
from jax import lax
from jax.experimental import pallas as pl
from jax.experimental.pallas import tpu as pltpu


def _pseudo_labels_kernel(w1t_ref, b1_ref, w2_ref, b2_ref, out_ref):
    """Whole forward pass, single grid point, all operands VMEM-resident.

    w1t_ref : (P, P)     = first_layer.weight^T
    b1_ref  : (1, P)     = first_layer.bias
    w2_ref  : (Lpad, P)  = second_layer.weight, zero-padded along labels
    b2_ref  : (1, Lpad)  = second_layer.bias, zero-padded
    out_ref : (P, Lpad)  lane-dense output slab (Lpad multiple of 128)
    """
    # first_layer + ReLU.  eye(P) @ W1^T is exactly W1^T, so no matmul needed.
    h = jnp.maximum(w1t_ref[...] + b1_ref[...], jnp.float32(0.0))

    # TODO(synk): nn.Dropout — identity in eval mode; training-mode masking
    # (pltpu.prng_seed / prng_random_bits + 1/(1-p) scaling) intentionally
    # omitted for deterministic inference.

    # second_layer: out = h @ W2^T + b2, with W2 passed untransposed.
    # Contract last dims of both operands (standard MXU trans_b pattern).
    out = lax.dot_general(
        h, w2_ref[...],
        dimension_numbers=(((1,), (1,)), ((), ())),
        preferred_element_type=jnp.float32,
    )
    out_ref[...] = out + b2_ref[...]


def pseudo_labels_generator(w1, b1, w2, b2):
    """Wrapper matching Pseudo_labels_generator.forward().

    w1: (P, P)  PyTorch nn.Linear(P, P).weight   (out, in)
    b1: (P,)    bias
    w2: (L, P)  PyTorch nn.Linear(P, L).weight   (out, in)
    b2: (L,)    bias
    Returns (P, L) float32.
    """
    P = w1.shape[0]
    L = w2.shape[0]
    # Pad the label dim to a multiple of 128 lanes for full-width vector stores.
    Lpad = max(128, ((L + 127) // 128) * 128)

    w1t = jnp.asarray(w1, jnp.float32).T                       # (P, P)
    b1r = jnp.asarray(b1, jnp.float32).reshape(1, P)           # (1, P)
    w2pad = jnp.zeros((Lpad, P), jnp.float32).at[:L, :].set(
        jnp.asarray(w2, jnp.float32))                          # (Lpad, P)
    b2pad = jnp.zeros((1, Lpad), jnp.float32).at[0, :L].set(
        jnp.asarray(b2, jnp.float32))                          # (1, Lpad)

    vmem_spec = pl.BlockSpec(memory_space=pltpu.MemorySpace.VMEM)
    out_pad = pl.pallas_call(
        _pseudo_labels_kernel,
        out_shape=jax.ShapeDtypeStruct((P, Lpad), jnp.float32),
        in_specs=[vmem_spec, vmem_spec, vmem_spec, vmem_spec],
        out_specs=vmem_spec,
    )(w1t, b1r, w2pad, b2pad)

    return out_pad[:, :L]


if __name__ == "__main__":
    # Small shapes consistent with the module's __init__:
    pseudo_inputs_num = 32   # P
    label_dim = 10           # L
    # dropout rate is irrelevant in eval mode.

    key = jax.random.PRNGKey(0)
    k1, k2, k3, k4 = jax.random.split(key, 4)

    # Deterministic parameter init, mimicking PyTorch's U(-1/sqrt(fan_in), ...).
    bound1 = 1.0 / jnp.sqrt(jnp.float32(pseudo_inputs_num))
    w1 = jax.random.uniform(k1, (pseudo_inputs_num, pseudo_inputs_num),
                            jnp.float32, -bound1, bound1)
    b1 = jax.random.uniform(k2, (pseudo_inputs_num,), jnp.float32,
                            -bound1, bound1)
    bound2 = 1.0 / jnp.sqrt(jnp.float32(pseudo_inputs_num))
    w2 = jax.random.uniform(k3, (label_dim, pseudo_inputs_num),
                            jnp.float32, -bound2, bound2)
    b2 = jax.random.uniform(k4, (label_dim,), jnp.float32, -bound2, bound2)

    out = pseudo_labels_generator(w1, b1, w2, b2)
    out = jax.block_until_ready(out)

    # Sanity check against a pure-JAX reference of the original math.
    eye = jnp.eye(pseudo_inputs_num, dtype=jnp.float32)
    ref = jnp.maximum(eye @ w1.T + b1, 0.0) @ w2.T + b2
    assert out.shape == (pseudo_inputs_num, label_dim)
    assert jnp.allclose(out, ref, atol=1e-5, rtol=1e-5)

    print("KERNEL_OK")
</pallas_src>

<mosaic_0001>
module attributes {stable_mosaic.version = 11 : i64} {
  func.func @_pseudo_labels_kernel(%arg0: memref<32x32xf32, #tpu.memory_space<vmem>>, %arg1: memref<1x32xf32, #tpu.memory_space<vmem>>, %arg2: memref<128x32xf32, #tpu.memory_space<vmem>>, %arg3: memref<1x128xf32, #tpu.memory_space<vmem>>, %arg4: memref<32x128xf32, #tpu.memory_space<vmem>>) attributes {dimension_semantics = [], scalar_prefetch = 0 : i64, scratch_operands = 0 : i64, tpu.core_type = #tpu.core_type<tc>} {
    %c0 = arith.constant 0 : index
    %c0_0 = arith.constant 0 : index
    %0 = vector.load %arg0[%c0, %c0_0] : memref<32x32xf32, #tpu.memory_space<vmem>>, vector<32x32xf32>
    %c0_1 = arith.constant 0 : index
    %c0_2 = arith.constant 0 : index
    %1 = vector.load %arg1[%c0_1, %c0_2] : memref<1x32xf32, #tpu.memory_space<vmem>>, vector<1x32xf32>
    %2 = vector.broadcast %1 : vector<1x32xf32> to vector<32x32xf32>
    %3 = arith.addf %0, %2 : vector<32x32xf32>
    %cst = arith.constant 0.000000e+00 : f32
    %4 = vector.broadcast %cst : f32 to vector<32x32xf32>
    %5 = arith.maximumf %3, %4 : vector<32x32xf32>
    %c0_3 = arith.constant 0 : index
    %c0_4 = arith.constant 0 : index
    %6 = vector.load %arg2[%c0_3, %c0_4] : memref<128x32xf32, #tpu.memory_space<vmem>>, vector<128x32xf32>
    %cst_5 = arith.constant dense<0.000000e+00> : vector<32x128xf32>
    %7 = tpu.matmul %5, %6, %cst_5 {dimension_numbers = #tpu.dot_dimension_numbers<[1], [1], [0], [0], [0, 0, 1, 0], [], []>} : vector<32x32xf32>, vector<128x32xf32>, vector<32x128xf32> -> vector<32x128xf32>
    %c0_6 = arith.constant 0 : index
    %c0_7 = arith.constant 0 : index
    %8 = vector.load %arg3[%c0_6, %c0_7] : memref<1x128xf32, #tpu.memory_space<vmem>>, vector<1x128xf32>
    %9 = vector.broadcast %8 : vector<1x128xf32> to vector<32x128xf32>
    %10 = arith.addf %7, %9 : vector<32x128xf32>
    %c0_8 = arith.constant 0 : index
    %c0_9 = arith.constant 0 : index
    %11 = vector.load %arg4[%c0_8, %c0_9] : memref<32x128xf32, #tpu.memory_space<vmem>>, vector<32x128xf32>
    tpu.vector_store %arg4[%c0_8, %c0_9], %10 {strides = array<i32>} : memref<32x128xf32, #tpu.memory_space<vmem>>, vector<32x128xf32>,
    return
  }
}

</mosaic_0001>

<bundles_post_ra>
// kernel: tpu_custom_call.1
= control target key start
LH: loop header
LB: loop body
LE: loop exit
PB: predicated region body
PF: predicated region fallthrough
CT: control target
= control target key end

     0   :  { %vm60_vm0 = vcmask 261120   ;;  %s534_s0 = inlined_call_operand.vmem [shape: f32[32,32], index: 0, kind: input, shape index: {}]   ;;  %s535_s1 = inlined_call_operand.vmem [shape: f32[1,32], index: 1, kind: input, shape index: {}]   ;;  %s536_s2 = inlined_call_operand.vmem [shape: f32[128,32], index: 2, kind: input, shape index: {}]   ;;  %s537_s3 = inlined_call_operand.vmem [shape: f32[1,128], index: 3, kind: input, shape index: {}]   ;;  %s538_s4 = inlined_call_operand.hbm [shape: f32[32,128], index: 4, kind: output, shape index: {}]  }
   0x1   :  { %v52_v0 = vld [vmem:[%s536_s2 + $0x78] sm:$0xff]  ;;  %v51_v1 = vld [vmem:[%s536_s2 + $0x70] sm:$0xff]  ;;  %v50_v2 = vld [vmem:[%s536_s2 + $0x68] sm:$0xff] }
   0x2   :  { %268 = vmatprep.subr.msk.mxu0 %vm60_vm0, %v52_v0  ;;  %306 = vmatprep.subr.msk.mxu1 %vm60_vm0, %v52_v0  ;;  %v18_v3 = vld [vmem:[%s534_s0] sm:$0xff]  ;;  %v20_v6 = vld [vmem:[%s534_s0 + $0x10] sm:$0xff] }
   0x3   :  { %269 = vmatpush3.xpose.msk.msra.mxu0 %vm60_vm0, %v52_v0  ;;  %322 = vmatpush3.xpose.msk.msra.mxu1 %vm60_vm0, %v52_v0  ;;  %v412_v4 = vld [vmem:[%s535_s1] ss:$0 sm:$0xff] }
   0x4   :  { %270 = vmatprep.subr.msk.mxu0 %vm60_vm0, %v51_v1  ;;  %307 = vmatprep.subr.msk.mxu1 %vm60_vm0, %v51_v1  ;;  %v29_v5 = vadd.f32 %v412_v4, %v18_v3  ;;  %v31_v7 = vadd.f32 %v412_v4, %v20_v6 }
   0x7   :  { %271 = vmatpush3.xpose.msk.msra.mxu0 %vm60_vm0, %v51_v1  ;;  %323 = vmatpush3.xpose.msk.msra.mxu1 %vm60_vm0, %v51_v1 }
   0x8   :  { %272 = vmatprep.subr.msk.mxu0 %vm60_vm0, %v50_v2  ;;  %308 = vmatprep.subr.msk.mxu1 %vm60_vm0, %v50_v2 }
   0x9   :  { %9 = vsyncpa [#allocation3], 0  ;;  %v49_v8 = vld [vmem:[%s536_s2 + $0x60] sm:$0xff]  ;;  %v33_v9 = vmax.f32 %v29_v5, 0.0  ;;  %v35_v10 = vmax.f32 %v31_v7, 0.0  ;;  %v48_v11 = vld [vmem:[%s536_s2 + $0x58] sm:$0xff] }
   0xa   :  { %v47_v12 = vld [vmem:[%s536_s2 + $0x50] sm:$0xff]  ;;  %v46_v13 = vld [vmem:[%s536_s2 + $0x48] sm:$0xff]  ;;  %v45_v14 = vld [vmem:[%s536_s2 + $0x40] sm:$0xff]  ;;  %s363_s29 = smov [#allocation2]  }
   0xb   :  { %273 = vmatpush3.xpose.msk.msra.mxu0 %vm60_vm0, %v50_v2  ;;  %324 = vmatpush3.xpose.msk.msra.mxu1 %vm60_vm0, %v50_v2  ;;  %v44_v15 = vld [vmem:[%s536_s2 + $0x38] sm:$0xff]  ;;  %v43_v16 = vld [vmem:[%s536_s2 + $0x30] sm:$0xff]  ;;  %v42_v17 = vld [vmem:[%s536_s2 + $0x28] sm:$0xff]  ;;  %s215_s30 = sshll.u32 %s363_s29, 4  ;;  %s216_s30 = int_to_ptr.vmem [resolvable:$true] %s215_s30 }
   0xc   :  { %274 = vmatprep.subr.msk.mxu0 %vm60_vm0, %v49_v8  ;;  %309 = vmatprep.subr.msk.mxu1 %vm60_vm0, %v49_v8  ;;  %v41_v18 = vld [vmem:[%s536_s2 + $0x20] sm:$0xff]  ;;  %v40_v19 = vld [vmem:[%s536_s2 + $0x18] sm:$0xff]  ;;  %v39_v20 = vld [vmem:[%s536_s2 + $0x10] sm:$0xff]  ;;  %s341_s5 = scalar_lea.vmem %s216_s30, 512  ;;  %p346_p1 = scmp.lt.s32.totalorder %s216_s30, %s216_s30 }
   0xd   :  { %300 = vmatprep.mubr.msk.f32.mxu0 %vm60_vm0, %v33_v9  ;;  %303 = vmatprep.mubr.msk.f32.mxu1 %vm60_vm0, %v35_v10  ;;  %v38_v21 = vld [vmem:[%s536_s2 + $0x8] sm:$0xff]  ;;  %v21_v23 = vld [vmem:[%s534_s0 + $0x18] sm:$0xff]  ;;  %v37_v24 = vld [vmem:[%s536_s2] sm:$0xff]  ;;  %p342_p0 = scmp.ne.s32.totalorder %s216_s30, %s341_s5  ;;  %p347_p2 = scmp.lt.s32.totalorder %s341_s5, %s341_s5 }
   0xe   :  { %v19_v22 = vld [vmem:[%s534_s0 + $0x8] sm:$0xff]  ;;  %v32_v26 = vadd.f32 %v412_v4, %v21_v23  ;;  %v227_v29 = vld [vmem:[%s537_s3] ss:$0 sm:$0xff] }
   0xf   :  { %275 = vmatpush3.xpose.msk.msra.mxu0 %vm60_vm0, %v49_v8  ;;  %325 = vmatpush3.xpose.msk.msra.mxu1 %vm60_vm0, %v49_v8  ;;  %v30_v25 = vadd.f32 %v412_v4, %v19_v22  ;;  %p348_p3 = por %p347_p2, %p346_p1 }
  0x10   :  { %276 = vmatprep.subr.msk.mxu0 %vm60_vm0, %v48_v11  ;;  %310 = vmatprep.subr.msk.mxu1 %vm60_vm0, %v48_v11  ;;  %v36_v28 = vmax.f32 %v32_v26, 0.0 }
  0x11   :  { %v34_v27 = vmax.f32 %v30_v25, 0.0  ;;  %p349_p4 = pnand %p348_p3, %p342_p0 }
  0x13   :  { %277 = vmatpush3.xpose.msk.msra.mxu0 %vm60_vm0, %v48_v11  ;;  %326 = vmatpush3.xpose.msk.msra.mxu1 %vm60_vm0, %v48_v11 }
  0x14   :  { %278 = vmatprep.subr.msk.mxu0 %vm60_vm0, %v47_v12  ;;  %311 = vmatprep.subr.msk.mxu1 %vm60_vm0, %v47_v12 }
  0x17   :  { %279 = vmatpush3.xpose.msk.msra.mxu0 %vm60_vm0, %v47_v12  ;;  %327 = vmatpush3.xpose.msk.msra.mxu1 %vm60_vm0, %v47_v12 }
  0x18   :  { %280 = vmatprep.subr.msk.mxu0 %vm60_vm0, %v46_v13  ;;  %312 = vmatprep.subr.msk.mxu1 %vm60_vm0, %v46_v13 }
  0x1b   :  { %281 = vmatpush3.xpose.msk.msra.mxu0 %vm60_vm0, %v46_v13  ;;  %328 = vmatpush3.xpose.msk.msra.mxu1 %vm60_vm0, %v46_v13 }
  0x1c   :  { %282 = vmatprep.subr.msk.mxu0 %vm60_vm0, %v45_v14  ;;  %313 = vmatprep.subr.msk.mxu1 %vm60_vm0, %v45_v14 }
  0x1f   :  { %283 = vmatpush3.xpose.msk.msra.mxu0 %vm60_vm0, %v45_v14  ;;  %329 = vmatpush3.xpose.msk.msra.mxu1 %vm60_vm0, %v45_v14 }
  0x20   :  { %284 = vmatprep.subr.msk.mxu0 %vm60_vm0, %v44_v15  ;;  %314 = vmatprep.subr.msk.mxu1 %vm60_vm0, %v44_v15 }
  0x23   :  { %285 = vmatpush3.xpose.msk.msra.mxu0 %vm60_vm0, %v44_v15  ;;  %330 = vmatpush3.xpose.msk.msra.mxu1 %vm60_vm0, %v44_v15 }
  0x24   :  { %286 = vmatprep.subr.msk.mxu0 %vm60_vm0, %v43_v16  ;;  %315 = vmatprep.subr.msk.mxu1 %vm60_vm0, %v43_v16 }
  0x27   :  { %287 = vmatpush3.xpose.msk.msra.mxu0 %vm60_vm0, %v43_v16  ;;  %331 = vmatpush3.xpose.msk.msra.mxu1 %vm60_vm0, %v43_v16 }
  0x28   :  { %288 = vmatprep.subr.msk.mxu0 %vm60_vm0, %v42_v17  ;;  %316 = vmatprep.subr.msk.mxu1 %vm60_vm0, %v42_v17 }
  0x2b   :  { %289 = vmatpush3.xpose.msk.msra.mxu0 %vm60_vm0, %v42_v17  ;;  %332 = vmatpush3.xpose.msk.msra.mxu1 %vm60_vm0, %v42_v17 }
  0x2c   :  { %290 = vmatprep.subr.msk.mxu0 %vm60_vm0, %v41_v18  ;;  %317 = vmatprep.subr.msk.mxu1 %vm60_vm0, %v41_v18 }
  0x2f   :  { %291 = vmatpush3.xpose.msk.msra.mxu0 %vm60_vm0, %v41_v18  ;;  %333 = vmatpush3.xpose.msk.msra.mxu1 %vm60_vm0, %v41_v18 }
  0x30   :  { %292 = vmatprep.subr.msk.mxu0 %vm60_vm0, %v40_v19  ;;  %318 = vmatprep.subr.msk.mxu1 %vm60_vm0, %v40_v19 }
  0x33   :  { %293 = vmatpush3.xpose.msk.msra.mxu0 %vm60_vm0, %v40_v19  ;;  %334 = vmatpush3.xpose.msk.msra.mxu1 %vm60_vm0, %v40_v19 }
  0x34   :  { %294 = vmatprep.subr.msk.mxu0 %vm60_vm0, %v39_v20  ;;  %319 = vmatprep.subr.msk.mxu1 %vm60_vm0, %v39_v20 }
  0x37   :  { %295 = vmatpush3.xpose.msk.msra.mxu0 %vm60_vm0, %v39_v20  ;;  %335 = vmatpush3.xpose.msk.msra.mxu1 %vm60_vm0, %v39_v20 }
  0x38   :  { %296 = vmatprep.subr.msk.mxu0 %vm60_vm0, %v38_v21  ;;  %320 = vmatprep.subr.msk.mxu1 %vm60_vm0, %v38_v21 }
  0x3b   :  { %297 = vmatpush3.xpose.msk.msra.mxu0 %vm60_vm0, %v38_v21  ;;  %336 = vmatpush3.xpose.msk.msra.mxu1 %vm60_vm0, %v38_v21 }
  0x3c   :  { %298 = vmatprep.subr.msk.mxu0 %vm60_vm0, %v37_v24  ;;  %321 = vmatprep.subr.msk.mxu1 %vm60_vm0, %v37_v24 }
  0x3f   :  { %299 = vmatpush3.xpose.msk.msra.mxu0 %vm60_vm0, %v37_v24  ;;  %337 = vmatpush3.xpose.msk.msra.mxu1 %vm60_vm0, %v37_v24 }
  0x42   :  { %301 = vmatmul.mubr.msk.f32.vlgmr.msra.gmra.mxu0 %vm60_vm0, %v34_v27  ;;  %304 = vmatmul.mubr.msk.f32.vlgmr.msra.gmra.mxu1 %vm60_vm0, %v36_v28 }
 0x102   :  { %v302_v30 = vpop.f32.mrf.mxu0  ;;  %v305_v31 = vpop.f32.mrf.mxu1 }
 0x103   :  { %v193_v32 = vadd.f32 %v302_v30, %v227_v29  ;;  %v203_v33 = vadd.f32 %v305_v31, %v227_v29 }
 0x104   :  { %v187_v34 = vpop.f32.mrf.mxu0  ;;  %v197_v35 = vpop.f32.mrf.mxu1 }
 0x105   :  { %207 = vst [vmem:[#allocation2 + $0x8] sm:$0xff] %v193_v32  ;;  %209 = vst [vmem:[#allocation2 + $0x18] sm:$0xff] %v203_v33  ;;  %v188_v36 = vadd.f32 %v227_v29, %v187_v34  ;;  %v198_v37 = vadd.f32 %v227_v29, %v197_v35 }
 0x107   :  { %206 = vst [vmem:[#allocation2] sm:$0xff] %v188_v36  ;;  %208 = vst [vmem:[#allocation2 + $0x10] sm:$0xff] %v198_v37 }
 0x108   :  { %352 = shalt.err (!%p349_p4)
}
 0x109   :  { %s364_s3 = smov 128   ;;  %s365_s6 = smov 8  }
 0x10a   :  { %221 = dma.vmem_to_hbm [thread:$0]  %s216_s30, 512, %s538_s4, [#allocation3], %s364_s3, %s364_s3, %s365_s6  }
 0x10b   :  { %361 = dma.done.wait [#allocation3], 512  }
 0x10c   :  { %362 = vsyncadd [#allocation3], 4294966784 }
 0x10d   :  { %225 = vsyncpa [#allocation3], 1 }

</bundles_post_ra>
